<compile_context>
chip_gen: v5e
topology: v5e:2x2
jax: 0.10.0
libtpu: 0.0.40
codegen_flags: <defaults>
</compile_context>

<pallas_src>
import functools

import jax
import jax.numpy as jnp
from jax.experimental import pallas as pl
from jax.experimental.pallas import tpu as pltpu


def _row_cosine_accumulate(x, c, o_ref, i, tb, b_true):
    """Accumulate sum over rows of clamp(1 - cos(x_r, c_r)) into o_ref (1,1)."""
    eps = jnp.float32(1e-12)
    s_xx = jnp.sum(x * x, axis=-1, keepdims=True)        # (tb, 1)
    s_cc = jnp.sum(c * c, axis=-1, keepdims=True)        # (tb, 1)
    s_xc = jnp.sum(x * c, axis=-1, keepdims=True)        # (tb, 1)
    denom = jnp.maximum(jnp.sqrt(s_xx), eps) * jnp.maximum(jnp.sqrt(s_cc), eps)
    dist = jnp.float32(1.0) - s_xc / denom                # (tb, 1)
    # clamp PER ROW before accumulation (matches torch.clamp(diag).mean()).
    clamped = jnp.clip(dist, 1e-12, 1e12)
    # Mask rows added only to pad B up to a tile multiple.
    row_ids = i * tb + jax.lax.broadcasted_iota(jnp.int32, (tb, 1), 0)
    contrib = jnp.where(row_ids < b_true, clamped, jnp.float32(0.0))
    o_ref[...] += jnp.sum(contrib, axis=0, keepdims=True)


def inner_cos_gather_kernel(x_ref, lab_ref, centers_ref, o_ref, *, tb, b_true, n_class):
    """In-kernel gather: centers table is VMEM-resident, rows picked via one-hot MXU matmul."""
    i = pl.program_id(0)

    @pl.when(i == 0)
    def _init():
        o_ref[...] = jnp.zeros_like(o_ref)

    x = x_ref[...].astype(jnp.float32)                    # (tb, D) cast in VMEM
    labels = lab_ref[...]                                 # (tb, 1) int32
    c_tab = centers_ref[...].astype(jnp.float32)          # (n_class, D) resident

    # One-hot matmul gather on the otherwise-idle MXU (no (B,D) HBM round-trip).
    class_ids = jax.lax.broadcasted_iota(jnp.int32, (tb, n_class), 1)
    onehot = jnp.where(labels == class_ids, jnp.float32(1.0), jnp.float32(0.0))
    c = jnp.dot(onehot, c_tab, preferred_element_type=jnp.float32)   # (tb, D)

    _row_cosine_accumulate(x, c, o_ref, i, tb, b_true)

    @pl.when(i == pl.num_programs(0) - 1)
    def _finalize():
        o_ref[...] = o_ref[...] * jnp.float32(1.0 / b_true)


def inner_cos_pregather_kernel(x_ref, c_ref, o_ref, *, tb, b_true):
    """Fallback path: per-row centers were gathered in the wrapper and are streamed."""
    i = pl.program_id(0)

    @pl.when(i == 0)
    def _init():
        o_ref[...] = jnp.zeros_like(o_ref)

    x = x_ref[...].astype(jnp.float32)                    # (tb, D)
    c = c_ref[...].astype(jnp.float32)                    # (tb, D)

    _row_cosine_accumulate(x, c, o_ref, i, tb, b_true)

    @pl.when(i == pl.num_programs(0) - 1)
    def _finalize():
        o_ref[...] = o_ref[...] * jnp.float32(1.0 / b_true)


def inner_cos_forward(centers, ref_emb, ref_label, *, force_pregather=False):
    """centers: (n_class, D), ref_emb: (B, D), ref_label: (B,) int -> scalar."""
    n_class, d = centers.shape
    b, d2 = ref_emb.shape
    assert d == d2, (d, d2)

    if centers.dtype != jnp.float32:
        centers = centers.astype(jnp.float32)

    table_bytes = n_class * d * 4
    use_resident_table = (not force_pregather) and table_bytes <= 8 * 1024 * 1024

    # Pick the largest batch tile whose double-buffered working set stays under
    # ~12 MiB (fits the default scoped VMEM on v5e/v6e/v7x with headroom).
    budget = 12 * 1024 * 1024
    fixed = table_bytes if use_resident_table else 0
    if use_resident_table:
        per_row = 2 * d * ref_emb.dtype.itemsize + 2 * 4 + 64   # x tile (x2) + label col
    else:
        per_row = 2 * d * ref_emb.dtype.itemsize + 2 * d * 4    # x tile (x2) + c tile (x2)
    tb = max(8, min(1024, (budget - fixed) // max(per_row, 1)))
    tb = (int(tb) // 8) * 8                                     # sublane-aligned
    b_ceil = ((b + 7) // 8) * 8
    tb = min(tb, b_ceil)
    b_pad = ((b + tb - 1) // tb) * tb
    num_blocks = b_pad // tb

    # Stream embeddings in their native dtype; pad batch to a tile multiple
    # (padded rows are masked out inside the kernel).
    x = ref_emb
    labels = ref_label.astype(jnp.int32).reshape(-1, 1)
    if b_pad != b:
        x = jnp.pad(x, ((0, b_pad - b), (0, 0)))
        labels = jnp.pad(labels, ((0, b_pad - b), (0, 0)))      # pad label 0 (masked anyway)

    if use_resident_table:
        kernel = functools.partial(
            inner_cos_gather_kernel, tb=tb, b_true=b, n_class=n_class)
        out = pl.pallas_call(
            kernel,
            out_shape=jax.ShapeDtypeStruct((1, 1), jnp.float32),
            grid=(num_blocks,),
            in_specs=[
                pl.BlockSpec((tb, d), lambda i: (i, 0)),        # ref_emb tile (streamed)
                pl.BlockSpec((tb, 1), lambda i: (i, 0)),        # labels tile
                pl.BlockSpec((n_class, d), lambda i: (0, 0)),   # center table (resident)
            ],
            out_specs=pl.BlockSpec((1, 1), lambda i: (0, 0)),   # resident accumulator
            compiler_params=pltpu.CompilerParams(
                dimension_semantics=("arbitrary",)),            # reduction over batch tiles
        )(x, labels, centers)
    else:
        # Huge center table: gather once in the wrapper and stream (B, D) centers.
        c = jnp.take(centers, ref_label.astype(jnp.int32), axis=0)
        if b_pad != b:
            c = jnp.pad(c, ((0, b_pad - b), (0, 0)))
        kernel = functools.partial(inner_cos_pregather_kernel, tb=tb, b_true=b)
        out = pl.pallas_call(
            kernel,
            out_shape=jax.ShapeDtypeStruct((1, 1), jnp.float32),
            grid=(num_blocks,),
            in_specs=[
                pl.BlockSpec((tb, d), lambda i: (i, 0)),        # ref_emb tile
                pl.BlockSpec((tb, d), lambda i: (i, 0)),        # pre-gathered centers tile
            ],
            out_specs=pl.BlockSpec((1, 1), lambda i: (0, 0)),
            compiler_params=pltpu.CompilerParams(
                dimension_semantics=("arbitrary",)),
        )(x, c)
    return out[0, 0]


if __name__ == "__main__":
    # Small, module-consistent shapes: B=8 embeddings, in_feature=32, n_class=4.
    B, in_feature, n_class = 8, 32, 4

    key = jax.random.PRNGKey(0)
    k_centers, k_emb, k_lab = jax.random.split(key, 3)

    # nn.Parameter(torch.randn(n_class, in_feature)) analogue.
    centers = jax.random.normal(k_centers, (n_class, in_feature), dtype=jnp.float32)
    ref_emb = jax.random.normal(k_emb, (B, in_feature), dtype=jnp.float32)
    ref_label = jax.random.randint(k_lab, (B,), 0, n_class, dtype=jnp.int32)

    # Pure-JAX reference (F.normalize eps semantics).
    cn = centers[ref_label]
    xn = ref_emb / jnp.maximum(jnp.linalg.norm(ref_emb, axis=-1, keepdims=True), 1e-12)
    cnn = cn / jnp.maximum(jnp.linalg.norm(cn, axis=-1, keepdims=True), 1e-12)
    ref = jnp.mean(jnp.clip(1.0 - jnp.sum(xn * cnn, axis=-1), 1e-12, 1e12))

    # Main path: in-kernel one-hot gather with a VMEM-resident center table.
    cos_dist = inner_cos_forward(centers, ref_emb, ref_label)
    jax.block_until_ready(cos_dist)
    assert jnp.allclose(cos_dist, ref, atol=1e-5), (cos_dist, ref)

    # Fallback path (wrapper-side gather) exercised for coverage.
    cos_dist_fb = inner_cos_forward(centers, ref_emb, ref_label, force_pregather=True)
    jax.block_until_ready(cos_dist_fb)
    assert jnp.allclose(cos_dist_fb, ref, atol=1e-5), (cos_dist_fb, ref)

    print("KERNEL_OK")
</pallas_src>

<mosaic_0001>
module attributes {stable_mosaic.version = 11 : i64} {
  func.func @inner_cos_gather_kernel(%arg0: i32, %arg1: memref<8x32xf32, #tpu.memory_space<vmem>>, %arg2: memref<8x1xi32, #tpu.memory_space<vmem>>, %arg3: memref<4x32xf32, #tpu.memory_space<vmem>>, %arg4: memref<1x1xf32, #tpu.memory_space<vmem>>) attributes {dimension_semantics = [#tpu.dimension_semantics<arbitrary>], iteration_bounds = array<i64: 1>, scalar_prefetch = 0 : i64, scratch_operands = 0 : i64, tpu.core_type = #tpu.core_type<tc>, window_params = [{transform_indices = @transform_0, window_bounds = array<i64: 8, 32>}, {transform_indices = @transform_1, window_bounds = array<i64: 8, 1>}, {pipeline_mode = #tpu.pipeline_mode<synchronous>, transform_indices = @transform_2, window_bounds = array<i64: 4, 32>}, {pipeline_mode = #tpu.pipeline_mode<synchronous>, transform_indices = @transform_3, window_bounds = array<i64: 1, 1>}]} {
    %c0_i32 = arith.constant 0 : i32
    %0 = arith.cmpi eq, %arg0, %c0_i32 : i32
    %1 = arith.extui %0 : i1 to i32
    %c0_i32_0 = arith.constant 0 : i32
    %2 = arith.cmpi ne, %1, %c0_i32_0 : i32
    scf.if %2 {
      %cst_25 = arith.constant 0.000000e+00 : f32
      %52 = vector.broadcast %cst_25 : f32 to vector<1x1xf32>
      %c0_26 = arith.constant 0 : index
      %c0_27 = arith.constant 0 : index
      %53 = vector.load %arg4[%c0_26, %c0_27] : memref<1x1xf32, #tpu.memory_space<vmem>>, vector<1x1xf32>
      tpu.vector_store %arg4[%c0_26, %c0_27], %52 {strides = array<i32>} : memref<1x1xf32, #tpu.memory_space<vmem>>, vector<1x1xf32>,
    } else {
    }
    %c0 = arith.constant 0 : index
    %c0_1 = arith.constant 0 : index
    %3 = vector.load %arg1[%c0, %c0_1] : memref<8x32xf32, #tpu.memory_space<vmem>>, vector<8x32xf32>
    %c0_2 = arith.constant 0 : index
    %c0_3 = arith.constant 0 : index
    %4 = vector.load %arg2[%c0_2, %c0_3] : memref<8x1xi32, #tpu.memory_space<vmem>>, vector<8x1xi32>
    %c0_4 = arith.constant 0 : index
    %c0_5 = arith.constant 0 : index
    %5 = vector.load %arg3[%c0_4, %c0_5] : memref<4x32xf32, #tpu.memory_space<vmem>>, vector<4x32xf32>
    %6 = tpu.iota {dimensions = array<i32: 1>} : vector<8x4xi32>
    %7 = vector.broadcast %4 : vector<8x1xi32> to vector<8x4xi32>
    %8 = arith.cmpi eq, %7, %6 : vector<8x4xi32>
    %cst = arith.constant 1.000000e+00 : f32
    %cst_6 = arith.constant 0.000000e+00 : f32
    %9 = vector.broadcast %cst : f32 to vector<8x4xf32>
    %10 = vector.broadcast %cst_6 : f32 to vector<8x4xf32>
    %11 = arith.select %8, %9, %10 : vector<8x4xi1>, vector<8x4xf32>
    %cst_7 = arith.constant dense<0.000000e+00> : vector<8x32xf32>
    %12 = tpu.matmul %11, %5, %cst_7 {dimension_numbers = #tpu.dot_dimension_numbers<[1], [0], [0], [1], [0, 0, 1, 1], [], []>} : vector<8x4xf32>, vector<4x32xf32>, vector<8x32xf32> -> vector<8x32xf32>
    %13 = arith.mulf %3, %3 : vector<8x32xf32>
    %cst_8 = arith.constant dense<0.000000e+00> : vector<8xf32>
    %14 = vector.multi_reduction <add>, %13, %cst_8 [1] : vector<8x32xf32> to vector<8xf32>
    %15 = vector.shape_cast %14 : vector<8xf32> to vector<8x1xf32>
    %16 = arith.mulf %12, %12 : vector<8x32xf32>
    %cst_9 = arith.constant dense<0.000000e+00> : vector<8xf32>
    %17 = vector.multi_reduction <add>, %16, %cst_9 [1] : vector<8x32xf32> to vector<8xf32>
    %18 = vector.shape_cast %17 : vector<8xf32> to vector<8x1xf32>
    %19 = arith.mulf %3, %12 : vector<8x32xf32>
    %cst_10 = arith.constant dense<0.000000e+00> : vector<8xf32>
    %20 = vector.multi_reduction <add>, %19, %cst_10 [1] : vector<8x32xf32> to vector<8xf32>
    %21 = vector.shape_cast %20 : vector<8xf32> to vector<8x1xf32>
    %22 = math.sqrt %15 : vector<8x1xf32>
    %cst_11 = arith.constant 9.99999996E-13 : f32
    %23 = vector.broadcast %cst_11 : f32 to vector<8x1xf32>
    %24 = arith.maximumf %22, %23 : vector<8x1xf32>
    %25 = math.sqrt %18 : vector<8x1xf32>
    %cst_12 = arith.constant 9.99999996E-13 : f32
    %26 = vector.broadcast %cst_12 : f32 to vector<8x1xf32>
    %27 = arith.maximumf %25, %26 : vector<8x1xf32>
    %28 = arith.mulf %24, %27 : vector<8x1xf32>
    %29 = arith.divf %21, %28 : vector<8x1xf32>
    %cst_13 = arith.constant 1.000000e+00 : f32
    %30 = vector.broadcast %cst_13 : f32 to vector<8x1xf32>
    %31 = arith.subf %30, %29 : vector<8x1xf32>
    %cst_14 = arith.constant 9.99999996E-13 : f32
    %cst_15 = arith.constant 9.99999995E+11 : f32
    %32 = vector.broadcast %cst_14 : f32 to vector<8x1xf32>
    %33 = arith.maximumf %32, %31 : vector<8x1xf32>
    %34 = vector.broadcast %cst_15 : f32 to vector<8x1xf32>
    %35 = arith.minimumf %34, %33 : vector<8x1xf32>
    %c8_i32 = arith.constant 8 : i32
    %36 = arith.muli %arg0, %c8_i32 : i32
    %37 = tpu.iota {dimensions = array<i32: 0>} : vector<8x1xi32>
    %38 = vector.broadcast %36 : i32 to vector<8x1xi32>
    %39 = arith.addi %38, %37 : vector<8x1xi32>
    %c8_i32_16 = arith.constant 8 : i32
    %40 = vector.broadcast %c8_i32_16 : i32 to vector<8x1xi32>
    %41 = arith.cmpi slt, %39, %40 : vector<8x1xi32>
    %cst_17 = arith.constant 0.000000e+00 : f32
    %42 = vector.broadcast %cst_17 : f32 to vector<8x1xf32>
    %43 = arith.select %41, %35, %42 : vector<8x1xi1>, vector<8x1xf32>
    %c0_18 = arith.constant 0 : index
    %c0_19 = arith.constant 0 : index
    %44 = vector.load %arg4[%c0_18, %c0_19] : memref<1x1xf32, #tpu.memory_space<vmem>>, vector<1x1xf32>
    %cst_20 = arith.constant dense<0.000000e+00> : vector<1xf32>
    %45 = vector.multi_reduction <add>, %43, %cst_20 [0] : vector<8x1xf32> to vector<1xf32>
    %46 = vector.shape_cast %45 : vector<1xf32> to vector<1x1xf32>
    %47 = arith.addf %44, %46 : vector<1x1xf32>
    %c0_21 = arith.constant 0 : index
    %c0_22 = arith.constant 0 : index
    %48 = vector.load %arg4[%c0_21, %c0_22] : memref<1x1xf32, #tpu.memory_space<vmem>>, vector<1x1xf32>
    tpu.vector_store %arg4[%c0_21, %c0_22], %47 {strides = array<i32>} : memref<1x1xf32, #tpu.memory_space<vmem>>, vector<1x1xf32>,
    %c0_i32_23 = arith.constant 0 : i32
    %49 = arith.cmpi eq, %arg0, %c0_i32_23 : i32
    %50 = arith.extui %49 : i1 to i32
    %c0_i32_24 = arith.constant 0 : i32
    %51 = arith.cmpi ne, %50, %c0_i32_24 : i32
    scf.if %51 {
      %c0_25 = arith.constant 0 : index
      %c0_26 = arith.constant 0 : index
      %52 = vector.load %arg4[%c0_25, %c0_26] : memref<1x1xf32, #tpu.memory_space<vmem>>, vector<1x1xf32>
      %cst_27 = arith.constant 1.250000e-01 : f32
      %53 = vector.broadcast %cst_27 : f32 to vector<1x1xf32>
      %54 = arith.mulf %52, %53 : vector<1x1xf32>
      %c0_28 = arith.constant 0 : index
      %c0_29 = arith.constant 0 : index
      %55 = vector.load %arg4[%c0_28, %c0_29] : memref<1x1xf32, #tpu.memory_space<vmem>>, vector<1x1xf32>
      tpu.vector_store %arg4[%c0_28, %c0_29], %54 {strides = array<i32>} : memref<1x1xf32, #tpu.memory_space<vmem>>, vector<1x1xf32>,
    } else {
    }
    return
  }
  func.func @transform_0(%arg0: i32) -> (i32, i32) {
    %c0_i32 = arith.constant 0 : i32
    %c0_i32_0 = arith.constant 0 : i32
    return %arg0, %c0_i32 : i32, i32
  }
  func.func @transform_1(%arg0: i32) -> (i32, i32) {
    %c0_i32 = arith.constant 0 : i32
    %c0_i32_0 = arith.constant 0 : i32
    return %arg0, %c0_i32 : i32, i32
  }
  func.func @transform_2(%arg0: i32) -> (i32, i32) {
    %c0_i32 = arith.constant 0 : i32
    %c0_i32_0 = arith.constant 0 : i32
    %c0_i32_1 = arith.constant 0 : i32
    return %c0_i32, %c0_i32_0 : i32, i32
  }
  func.func @transform_3(%arg0: i32) -> (i32, i32) {
    %c0_i32 = arith.constant 0 : i32
    %c0_i32_0 = arith.constant 0 : i32
    %c0_i32_1 = arith.constant 0 : i32
    return %c0_i32, %c0_i32_0 : i32, i32
  }
}

</mosaic_0001>

<bundles_post_ra>
// kernel: tpu_custom_call.1
= control target key start
LH: loop header
LB: loop body
LE: loop exit
PB: predicated region body
PF: predicated region fallthrough
CT: control target
= control target key end

     0   :  { %8 = vsyncpa [#allocation3], 0  ;;  %s278_s0 = inlined_call_operand.vmem [shape: f32[8,32], index: 0, kind: input, shape index: {}]   ;;  %s279_s1 = inlined_call_operand.vmem [shape: s32[8,1], index: 1, kind: input, shape index: {}]   ;;  %s280_s2 = inlined_call_operand.hbm [shape: f32[4,32], index: 2, kind: input, shape index: {}]   ;;  %s281_s3 = inlined_call_operand.hbm [shape: f32[1,1], index: 3, kind: output, shape index: {}]  }
   0x1   :  { %9 = vsyncpa [#allocation4], 0  ;;  %s19_s14 = sshll.u32 %s280_s2, 4  ;;  %s236_s15 = smov [#allocation2]   ;;  %s20_s14 = int_to_ptr.hbm [resolvable:$true] %s19_s14 }
   0x2   :  { %s21_s16 = sshll.u32 %s236_s15, 4  ;;  %s22_s16 = int_to_ptr.vmem [resolvable:$true] %s21_s16 }
   0x3   :  { %24 = dma.hbm_to_vmem [thread:$0]  %s20_s14, 64, %s22_s16, [#allocation3]  }
   0x4   :  { %232 = dma.done.wait [#allocation3], 64  }
   0x5   :  { %233 = vsyncadd [#allocation3], 4294967232  ;;  %vm33_vm0 = vcmask 0   ;;  %v237_v0 = vmov 0   ;;  %v238_v1 = vmov 0.0   ;;  %v36_v2 = vld [vmem:[%s279_s1] sm:$0xff]  ;;  %v38_v7 = vlaneseq }
   0x6   :  { %177 = vset.pattern.permute.xlu0 %v237_v0  ;;  %34 = vst.msk [vmem:[#allocation5] sm:$0x1] %vm33_vm0, %v238_v1  ;;  %v37_v3 = vld [vmem:[#allocation2] sm:$0xf]  ;;  %vm49_vm1 = vcmask 1043456   ;;  %vm74_vm2 = vcmask 261120  }
   0x7   :  { %41 = vperm.xlu0 %177, %v36_v2   ;;  %171 = vmatpush.msk.msra.mxu0 %vm49_vm1, %v37_v3  ;;  %v35_v4 = vld [vmem:[%s278_s0] sm:$0xff]  ;;  %v39_v8 = vand.u32 127, %v38_v7  ;;  %vm45_vm3 = vcmask 31744   ;;  %s239_s0 = smov [#allocation5]   ;;  %s161_s22 = sshll.u32 %s281_s3, 4  ;;  %s162_s22 = int_to_ptr.hbm [resolvable:$true] %s161_s22 }
   0x8   :  { %v73_v5 = vmul.f32 %v35_v4, %v35_v4  ;;  %s159_s1 = sshll.u32 %s239_s0, 4  ;;  %s160_s1 = int_to_ptr.vmem [resolvable:$true] %s159_s1 }
   0xa   :  { %v75_v6 = vsel %vm74_vm2, %v73_v5, 0.0 }
   0xd   :  { %v138_v61 = vld [vmem:[#allocation5] sm:$0x1] }
  0x31   :  { %76 = vadd.xlane.f32.xlu0 %v75_v6 }
  0x79   :  { %v42_v9 = vpop.permute.xlu0 %41 }
  0x7a   :  { %vm43_vm4 = vcmp.eq.s32.totalorder %v42_v9, %v39_v8 }
  0x7b   :  { %v44_v10 = vsel %vm43_vm4, 1.0, %v238_v1 }
  0x7c   :  { %172 = vmatmul.msk.f32.vlgmr.msra.gmra.mxu0 %vm45_vm3, %v44_v10 }
  0xa4   :  { %v77_v16 = vpop.xlane.xlu0 %76 }
  0xa5   :  { %178 = vrsqrt.f32 %v77_v16  ;;  %vm93_vm5 = vcmp.eq.f32.partialorder %v77_v16, inf  ;;  %v96_v30 = vand.u32 2147483648, %v77_v16  ;;  %vm95_vm6 = vcmp.eq.f32.partialorder %v77_v16, 0.0 }
  0xab   :  { %v179_v17 = vpop.eup %178 }
  0xac   :  { %v87_v18 = vmul.f32 %v179_v17, %v77_v16 }
  0xae   :  { %v88_v19 = vmul.f32 %v179_v17, %v87_v18 }
  0xb0   :  { %v89_v20 = vmul.f32 0.5, %v88_v19 }
  0xb2   :  { %v90_v22 = vsub.f32 1.5, %v89_v20 }
  0xb4   :  { %v91_v24 = vmul.f32 %v179_v17, %v90_v22 }
  0xb6   :  { %v92_v27 = vmul.f32 %v91_v24, %v77_v16 }
  0xb8   :  { %v94_v31 = vsel %vm93_vm5, %v77_v16, %v92_v27 }
  0xb9   :  { %v97_v34 = vsel %vm95_vm6, %v96_v30, %v94_v31 }
  0xba   :  { %v98_v38 = vmax.f32 %v97_v34, 1e-12 }
  0xf9   :  { %v70_v11 = vpop.f32.mrf.mxu0 }
  0xfa   :  { %v78_v12 = vmul.f32 %v70_v11, %v70_v11  ;;  %v82_v14 = vmul.f32 %v70_v11, %v35_v4 }
  0xfc   :  { %v79_v13 = vsel %vm74_vm2, %v78_v12, 0.0  ;;  %v83_v15 = vsel %vm74_vm2, %v82_v14, 0.0 }
  0xfd   :  { %80 = vadd.xlane.f32.xlu1 %v79_v13 }
 0x105   :  { %84 = vadd.xlane.f32.xlu1 %v83_v15 }
 0x170   :  { %v81_v21 = vpop.xlane.xlu1 %80 }
 0x171   :  { %180 = vrsqrt.f32 %v81_v21  ;;  %vm106_vm7 = vcmp.eq.f32.partialorder %v81_v21, inf  ;;  %v109_v35 = vand.u32 2147483648, %v81_v21  ;;  %vm108_vm8 = vcmp.eq.f32.partialorder %v81_v21, 0.0 }
 0x177   :  { %v181_v23 = vpop.eup %180 }
 0x178   :  { %v100_v25 = vmul.f32 %v181_v23, %v81_v21  ;;  %v85_v50 = vpop.xlane.xlu1 %84 }
 0x17a   :  { %v101_v26 = vmul.f32 %v181_v23, %v100_v25 }
 0x17c   :  { %v102_v28 = vmul.f32 0.5, %v101_v26 }
 0x17e   :  { %v103_v29 = vsub.f32 1.5, %v102_v28 }
 0x180   :  { %v104_v32 = vmul.f32 %v181_v23, %v103_v29 }
 0x182   :  { %v105_v33 = vmul.f32 %v104_v32, %v81_v21 }
 0x184   :  { %v107_v36 = vsel %vm106_vm7, %v81_v21, %v105_v33 }
 0x185   :  { %v110_v37 = vsel %vm108_vm8, %v109_v35, %v107_v36 }
 0x186   :  { %v111_v39 = vmax.f32 %v110_v37, 1e-12 }
 0x188   :  { %v112_v40 = vmul.f32 %v111_v39, %v98_v38 }
 0x18a   :  { %182 = vrcp.f32 %v112_v40  ;;  %v124_v44 = vand.u32 2147483648, %v112_v40  ;;  %v122_v46 = vand.u32 2147483647, %v112_v40  ;;  %vm118_vm10 = vweird.f32 %v112_v40 }
 0x18c   :  { %v125_v48 = vor.u32 1.1754944e-38, %v124_v44  ;;  %vm123_vm12 = vcmp.eq.f32.partialorder %v122_v46, 8.507059e+37 }
 0x190   :  { %v183_v41 = vpop.eup %182 }
 0x191   :  { %v114_v42 = vmul.f32 %v183_v41, %v112_v40  ;;  %vm119_vm9 = vweird.f32 %v183_v41 }
 0x192   :  { %vm120_vm11 = vmor %vm118_vm10, %vm119_vm9 }
 0x193   :  { %v115_v43 = vsub.f32 1.0, %v114_v42 }
 0x195   :  { %v116_v45 = vmul.f32 %v183_v41, %v115_v43 }
 0x197   :  { %v117_v47 = vadd.f32 %v183_v41, %v116_v45 }
 0x199   :  { %v121_v49 = vsel %vm120_vm11, %v183_v41, %v117_v47 }
 0x19a   :  { %v126_v51 = vsel %vm123_vm12, %v125_v48, %v121_v49 }
 0x19b   :  { %v127_v52 = vmul.f32 %v126_v51, %v85_v50 }
 0x19d   :  { %v128_v53 = vsub.f32 1.0, %v127_v52 }
 0x19f   :  { %v129_v54 = vmax.f32 %v128_v53, 1e-12 }
 0x1a1   :  { %v130_v55 = vmin.f32 %v129_v54, 1e+12 }
 0x1a3   :  { %v139_v56 = vrot.slane %v130_v55, 4 }
 0x1a5   :  { %v140_v57 = vadd.f32 %v139_v56, %v130_v55 }
 0x1a7   :  { %v141_v58 = vrot.slane %v140_v57, 2 }
 0x1a9   :  { %v142_v59 = vadd.f32 %v141_v58, %v140_v57 }
 0x1ab   :  { %v143_v60 = vrot.slane %v142_v59, 1 }
 0x1ad   :  { %v144_v62 = vadd.f32 %v143_v60, %v142_v59 }
 0x1af   :  { %v145_v63 = vadd.f32 %v144_v62, %v138_v61 }
 0x1b1   :  { %147 = vst.msk [vmem:[#allocation5] sm:$0x1] %vm33_vm0, %v145_v63 }
 0x1b8   :  { %v151_v0 = vld [vmem:[#allocation5] sm:$0x1] }
 0x1b9   :  { %v152_v1 = vmul.f32 0.125, %v151_v0 }
 0x1bb   :  { %153 = vst.msk [vmem:[#allocation5] sm:$0x1] %vm33_vm0, %v152_v1 }
 0x1bc   :  { %164 = dma.vmem_to_hbm [thread:$0]  %s160_s1, 16, %s162_s22, [#allocation4]  }
 0x1bd   :  { %234 = dma.done.wait [#allocation4], 16  }
 0x1be   :  { %235 = vsyncadd [#allocation4], 4294967280 }
 0x1bf   :  { %169 = vsyncpa [#allocation3], 1 }
 0x1c0   :  { %170 = vsyncpa [#allocation4], 1 }

</bundles_post_ra>
